<compile_context>
chip_gen: v5e
topology: v5e:2x2
jax: 0.10.0
libtpu: 0.0.40
codegen_flags: <defaults>
</compile_context>

<pallas_src>
import functools

import jax
import jax.numpy as jnp
from jax import lax
from jax.experimental import pallas as pl
from jax.experimental.pallas import tpu as pltpu


_VMEM_LIMIT_BYTES = 32 * 1024 * 1024   # explicit scoped-VMEM bump (safe on v5e/v6e/v7x)
_TILE_BUDGET_BYTES = 8 * 1024 * 1024   # target for double-buffered in+out tiles


# ---------------------------------------------------------------------------
# Fused kernel: pool + excitation MLP + scale in one pass (1 HBM read, 1 write)
# ---------------------------------------------------------------------------
def _se_fused_kernel(x_ref, w1t_ref, b1_ref, w2t_ref, b2_ref, o_ref,
                     *, spatial_axis, inv_hw):
    x = x_ref[...]                                           # (Bt,C,HW) or (Bt,HW,C)
    # f32-accumulated mean, no full-tile upcast of x.
    pooled = jnp.sum(x, axis=spatial_axis, dtype=jnp.float32) * inv_hw    # (Bt, C)
    h = jnp.dot(pooled, w1t_ref[...],
                preferred_element_type=jnp.float32) + b1_ref[...]         # (Bt, Cint)
    h = h * jax.nn.sigmoid(h)                                             # SiLU
    s = jax.nn.sigmoid(jnp.dot(h, w2t_ref[...],
                               preferred_element_type=jnp.float32) + b2_ref[...])
    s = s.astype(x.dtype)                                                 # (Bt, C)
    if spatial_axis == 2:
        o_ref[...] = x * s[:, :, None]
    else:
        o_ref[...] = x * s[:, None, :]


# ---------------------------------------------------------------------------
# Split path (large C*HW): pass 1 = pool + MLP, pass 2 = broadcast scale
# ---------------------------------------------------------------------------
def _se_pool_kernel(x_ref, w1t_ref, b1_ref, w2t_ref, b2_ref, s_ref, acc_ref,
                    *, spatial_axis, hw_total, hw_tile, needs_mask):
    h_idx = pl.program_id(1)

    @pl.when(h_idx == 0)
    def _():
        acc_ref[...] = jnp.zeros_like(acc_ref)

    x = x_ref[...]
    if needs_mask:  # partial last spatial chunk: mask padded lanes out of the sum
        pos = h_idx * hw_tile + lax.broadcasted_iota(jnp.int32, x.shape, spatial_axis)
        x = jnp.where(pos < hw_total, x, jnp.zeros_like(x))
    acc_ref[...] += jnp.sum(x, axis=spatial_axis, dtype=jnp.float32)      # (Bt, C)

    @pl.when(h_idx == pl.num_programs(1) - 1)
    def _():
        pooled = acc_ref[...] * (1.0 / hw_total)
        h = jnp.dot(pooled, w1t_ref[...],
                    preferred_element_type=jnp.float32) + b1_ref[...]
        h = h * jax.nn.sigmoid(h)
        s = jax.nn.sigmoid(jnp.dot(h, w2t_ref[...],
                                   preferred_element_type=jnp.float32) + b2_ref[...])
        s_ref[...] = s[:, None, :]                                        # (Bt, 1, C)


def _se_scale_kernel(x_ref, s_ref, o_ref, *, spatial_axis):
    x = x_ref[...]
    s = s_ref[...][:, 0, :].astype(x.dtype)                               # (Bt, C)
    if spatial_axis == 2:
        o_ref[...] = x * s[:, :, None]
    else:
        o_ref[...] = x * s[:, None, :]


# ---------------------------------------------------------------------------
# pallas_call wrappers
# ---------------------------------------------------------------------------
def _se_fused(x_flat, w1t, b1r, w2t, b2r, *, spatial_axis, hw, bt):
    B = x_flat.shape[0]
    C, Cint = w1t.shape
    itemsize = jnp.dtype(x_flat.dtype).itemsize
    x_block = (bt, C, hw) if spatial_axis == 2 else (bt, hw, C)
    x_map = lambda b: (b, 0, 0)
    w_map = lambda b: (0, 0)

    cost = pl.CostEstimate(
        flops=int(2 * B * C * hw + 4 * B * C * Cint),
        transcendentals=int(B * (C + Cint)),
        bytes_accessed=int(2 * B * C * hw * itemsize))

    kernel = functools.partial(_se_fused_kernel,
                               spatial_axis=spatial_axis, inv_hw=1.0 / hw)
    return pl.pallas_call(
        kernel,
        out_shape=jax.ShapeDtypeStruct(x_flat.shape, x_flat.dtype),
        grid_spec=pltpu.PrefetchScalarGridSpec(
            num_scalar_prefetch=0,
            grid=(pl.cdiv(B, bt),),
            in_specs=[
                pl.BlockSpec(x_block, x_map),
                pl.BlockSpec((C, Cint), w_map),
                pl.BlockSpec((1, Cint), w_map),
                pl.BlockSpec((Cint, C), w_map),
                pl.BlockSpec((1, C), w_map),
            ],
            out_specs=pl.BlockSpec(x_block, x_map),
        ),
        compiler_params=pltpu.CompilerParams(
            dimension_semantics=("parallel",),
            vmem_limit_bytes=_VMEM_LIMIT_BYTES),
        cost_estimate=cost,
    )(x_flat, w1t, b1r, w2t, b2r)


def _se_split(x_flat, w1t, b1r, w2t, b2r, *, spatial_axis, hw, tile_budget_bytes):
    B = x_flat.shape[0]
    C, Cint = w1t.shape
    itemsize = jnp.dtype(x_flat.dtype).itemsize

    # Spatial tile: a multiple of 128 lanes (or the full extent if smaller),
    # sized so double-buffered in+out chunks fit the budget.
    thw = max(1, tile_budget_bytes // (4 * C * itemsize))
    thw = max(128, (thw // 128) * 128)
    thw = min(thw, hw)
    n_hw = pl.cdiv(hw, thw)
    bt = max(1, min(B, tile_budget_bytes // (4 * C * thw * itemsize)))
    n_b = pl.cdiv(B, bt)
    needs_mask = (n_hw * thw != hw)

    if spatial_axis == 2:
        x_block = (bt, C, thw)
        x_map = lambda b, h: (b, 0, h)
    else:
        x_block = (bt, thw, C)
        x_map = lambda b, h: (b, h, 0)
    s_block = (bt, 1, C)
    s_map = lambda b, h: (b, 0, 0)
    w_map = lambda b, h: (0, 0)

    # Pass 1: global-average-pool (cross-chunk f32 accumulation) + MLP -> gates.
    pool_kernel = functools.partial(_se_pool_kernel, spatial_axis=spatial_axis,
                                    hw_total=hw, hw_tile=thw, needs_mask=needs_mask)
    gates = pl.pallas_call(
        pool_kernel,
        out_shape=jax.ShapeDtypeStruct((B, 1, C), jnp.float32),
        grid_spec=pltpu.PrefetchScalarGridSpec(
            num_scalar_prefetch=0,
            grid=(n_b, n_hw),
            in_specs=[
                pl.BlockSpec(x_block, x_map),
                pl.BlockSpec((C, Cint), w_map),
                pl.BlockSpec((1, Cint), w_map),
                pl.BlockSpec((Cint, C), w_map),
                pl.BlockSpec((1, C), w_map),
            ],
            out_specs=pl.BlockSpec(s_block, s_map),
            scratch_shapes=[pltpu.VMEM((bt, C), jnp.float32)],
        ),
        compiler_params=pltpu.CompilerParams(
            dimension_semantics=("parallel", "arbitrary"),
            vmem_limit_bytes=_VMEM_LIMIT_BYTES),
        cost_estimate=pl.CostEstimate(
            flops=int(B * C * hw + 4 * B * C * Cint),
            transcendentals=int(B * (C + Cint)),
            bytes_accessed=int(B * C * hw * itemsize + 4 * B * C)),
    )(x_flat, w1t, b1r, w2t, b2r)

    # Pass 2: broadcast-scale the input by the per-channel gates (fully parallel).
    scale_kernel = functools.partial(_se_scale_kernel, spatial_axis=spatial_axis)
    return pl.pallas_call(
        scale_kernel,
        out_shape=jax.ShapeDtypeStruct(x_flat.shape, x_flat.dtype),
        grid_spec=pltpu.PrefetchScalarGridSpec(
            num_scalar_prefetch=0,
            grid=(n_b, n_hw),
            in_specs=[
                pl.BlockSpec(x_block, x_map),
                pl.BlockSpec(s_block, s_map),
            ],
            out_specs=pl.BlockSpec(x_block, x_map),
        ),
        compiler_params=pltpu.CompilerParams(
            dimension_semantics=("parallel", "parallel"),
            vmem_limit_bytes=_VMEM_LIMIT_BYTES),
        cost_estimate=pl.CostEstimate(
            flops=int(B * C * hw),
            transcendentals=0,
            bytes_accessed=int(2 * B * C * hw * itemsize + 4 * B * C)),
    )(x_flat, gates)


def se_block(x_nchw, w1, b1, w2, b2, *,
             tile_budget_bytes=_TILE_BUDGET_BYTES, force_split=False):
    """SEBlock forward. x_nchw: (B,C,H,W); w1: (Cint,C); b1: (Cint,); w2: (C,Cint); b2: (C,)."""
    B, C, H, W = x_nchw.shape
    Cint = w1.shape[0]
    HW = H * W
    itemsize = jnp.dtype(x_nchw.dtype).itemsize

    # Layout: put a 128-multiple dimension on lanes so the full-tensor store is
    # unmasked / lane-dense.
    if HW % 128 == 0 or C % 128 != 0:
        spatial_axis = 2
        x_flat = x_nchw.reshape(B, C, HW)                 # (B, C, HW)
    else:
        spatial_axis = 1
        x_flat = jnp.transpose(x_nchw.reshape(B, C, HW), (0, 2, 1))  # (B, HW, C)

    # Tiny weights, pre-transposed once so the kernel does (Bt,C) @ (C,Cint).
    w1t = jnp.transpose(w1)            # (C, Cint)
    w2t = jnp.transpose(w2)            # (Cint, C)
    b1r = b1.reshape(1, Cint)
    b2r = b2.reshape(1, C)

    per_elem_bytes = 4 * C * HW * itemsize   # double-buffered in + out per batch element
    if force_split or per_elem_bytes > tile_budget_bytes:
        out_flat = _se_split(x_flat, w1t, b1r, w2t, b2r,
                             spatial_axis=spatial_axis, hw=HW,
                             tile_budget_bytes=tile_budget_bytes)
    else:
        bt = max(1, min(B, tile_budget_bytes // per_elem_bytes))
        out_flat = _se_fused(x_flat, w1t, b1r, w2t, b2r,
                             spatial_axis=spatial_axis, hw=HW, bt=bt)

    if spatial_axis == 1:
        out_flat = jnp.transpose(out_flat, (0, 2, 1))
    return out_flat.reshape(B, C, H, W)


# ---------------------------------------------------------------------------
# Pure-JAX reference & self-test
# ---------------------------------------------------------------------------
def se_block_ref(x, w1, b1, w2, b2):
    y = jnp.mean(x, axis=(2, 3))
    h = jax.nn.silu(y @ w1.T + b1)
    s = jax.nn.sigmoid(h @ w2.T + b2)
    return x * s[:, :, None, None]


def _make_params(key, C):
    Cint = max(C // 8, 1)
    k1, k2, k3, k4 = jax.random.split(key, 4)
    w1 = 0.1 * jax.random.normal(k1, (Cint, C), dtype=jnp.float32)
    b1 = 0.1 * jax.random.normal(k2, (Cint,), dtype=jnp.float32)
    w2 = 0.1 * jax.random.normal(k3, (C, Cint), dtype=jnp.float32)
    b2 = 0.1 * jax.random.normal(k4, (C,), dtype=jnp.float32)
    return w1, b1, w2, b2


if __name__ == "__main__":
    key = jax.random.PRNGKey(0)

    # Primary case: SEBlock(input_channels=4) on (2, 4, 16, 16)
    # -> fused single-pass kernel, spatial dim (256) on lanes, batch-blocked.
    kx, kp, key = jax.random.split(key, 3)
    x = jax.random.normal(kx, (2, 4, 16, 16), dtype=jnp.float32)
    w1, b1, w2, b2 = _make_params(kp, 4)
    out = jax.block_until_ready(se_block(x, w1, b1, w2, b2))
    ref = se_block_ref(x, w1, b1, w2, b2)
    assert out.shape == x.shape
    assert jnp.allclose(out, ref, atol=1e-5, rtol=1e-5)

    # Channels-on-lanes layout (HW=49 not a multiple of 128, C=128 is), fused path.
    kx, kp, key = jax.random.split(key, 3)
    x = jax.random.normal(kx, (2, 128, 7, 7), dtype=jnp.float32)
    w1, b1, w2, b2 = _make_params(kp, 128)
    out = jax.block_until_ready(se_block(x, w1, b1, w2, b2))
    assert jnp.allclose(out, se_block_ref(x, w1, b1, w2, b2), atol=1e-5, rtol=1e-5)

    # Split path (pool+MLP then scale) with spatial tiling + mask, forced at a
    # tiny budget to exercise the large-feature-map path at small shapes.
    kx, kp, key = jax.random.split(key, 3)
    x = jax.random.normal(kx, (2, 8, 15, 20), dtype=jnp.float32)
    w1, b1, w2, b2 = _make_params(kp, 8)
    out = jax.block_until_ready(
        se_block(x, w1, b1, w2, b2, tile_budget_bytes=4096, force_split=True))
    assert jnp.allclose(out, se_block_ref(x, w1, b1, w2, b2), atol=1e-5, rtol=1e-5)

    # Split path combined with channels-on-lanes layout.
    kx, kp, key = jax.random.split(key, 3)
    x = jax.random.normal(kx, (2, 128, 7, 7), dtype=jnp.float32)
    w1, b1, w2, b2 = _make_params(kp, 128)
    out = jax.block_until_ready(
        se_block(x, w1, b1, w2, b2, tile_budget_bytes=4096, force_split=True))
    assert jnp.allclose(out, se_block_ref(x, w1, b1, w2, b2), atol=1e-5, rtol=1e-5)

    print("KERNEL_OK")
</pallas_src>

<mosaic_0001>
module attributes {stable_mosaic.version = 11 : i64} {
  func.func @_se_fused_kernel(%arg0: i32, %arg1: memref<2x4x256xf32, #tpu.memory_space<vmem>>, %arg2: memref<4x1xf32, #tpu.memory_space<vmem>>, %arg3: memref<1x1xf32, #tpu.memory_space<vmem>>, %arg4: memref<1x4xf32, #tpu.memory_space<vmem>>, %arg5: memref<1x4xf32, #tpu.memory_space<vmem>>, %arg6: memref<2x4x256xf32, #tpu.memory_space<vmem>>) attributes {dimension_semantics = [#tpu.dimension_semantics<parallel>], iteration_bounds = array<i64: 1>, scalar_prefetch = 0 : i64, scratch_operands = 0 : i64, tpu.core_type = #tpu.core_type<tc>, window_params = [{transform_indices = @transform_0, window_bounds = array<i64: 2, 4, 256>}, {pipeline_mode = #tpu.pipeline_mode<synchronous>, transform_indices = @transform_1, window_bounds = array<i64: 4, 1>}, {pipeline_mode = #tpu.pipeline_mode<synchronous>, transform_indices = @transform_2, window_bounds = array<i64: 1, 1>}, {pipeline_mode = #tpu.pipeline_mode<synchronous>, transform_indices = @transform_3, window_bounds = array<i64: 1, 4>}, {pipeline_mode = #tpu.pipeline_mode<synchronous>, transform_indices = @transform_4, window_bounds = array<i64: 1, 4>}, {transform_indices = @transform_5, window_bounds = array<i64: 2, 4, 256>}]} {
    %c0 = arith.constant 0 : index
    %c0_0 = arith.constant 0 : index
    %c0_1 = arith.constant 0 : index
    %0 = vector.load %arg1[%c0, %c0_0, %c0_1] : memref<2x4x256xf32, #tpu.memory_space<vmem>>, vector<2x4x256xf32>
    %cst = arith.constant dense<0.000000e+00> : vector<2x4xf32>
    %1 = vector.multi_reduction <add>, %0, %cst [2] : vector<2x4x256xf32> to vector<2x4xf32>
    %cst_2 = arith.constant 3.906250e-03 : f32
    %2 = vector.broadcast %cst_2 : f32 to vector<2x4xf32>
    %3 = arith.mulf %1, %2 : vector<2x4xf32>
    %c0_3 = arith.constant 0 : index
    %c0_4 = arith.constant 0 : index
    %4 = vector.load %arg2[%c0_3, %c0_4] : memref<4x1xf32, #tpu.memory_space<vmem>>, vector<4x1xf32>
    %cst_5 = arith.constant dense<0.000000e+00> : vector<2x1xf32>
    %5 = tpu.matmul %3, %4, %cst_5 {dimension_numbers = #tpu.dot_dimension_numbers<[1], [0], [0], [1], [0, 0, 1, 1], [], []>} : vector<2x4xf32>, vector<4x1xf32>, vector<2x1xf32> -> vector<2x1xf32>
    %c0_6 = arith.constant 0 : index
    %c0_7 = arith.constant 0 : index
    %6 = vector.load %arg3[%c0_6, %c0_7] : memref<1x1xf32, #tpu.memory_space<vmem>>, vector<1x1xf32>
    %7 = vector.broadcast %6 : vector<1x1xf32> to vector<2x1xf32>
    %8 = arith.addf %5, %7 : vector<2x1xf32>
    %9 = arith.negf %8 : vector<2x1xf32>
    %10 = math.exp %9 : vector<2x1xf32>
    %cst_8 = arith.constant 1.000000e+00 : f32
    %11 = vector.broadcast %cst_8 : f32 to vector<2x1xf32>
    %12 = arith.addf %11, %10 : vector<2x1xf32>
    %13 = arith.divf %11, %12 : vector<2x1xf32>
    %14 = arith.mulf %8, %13 : vector<2x1xf32>
    %c0_9 = arith.constant 0 : index
    %c0_10 = arith.constant 0 : index
    %15 = vector.load %arg4[%c0_9, %c0_10] : memref<1x4xf32, #tpu.memory_space<vmem>>, vector<1x4xf32>
    %cst_11 = arith.constant dense<0.000000e+00> : vector<2x4xf32>
    %16 = tpu.matmul %14, %15, %cst_11 {dimension_numbers = #tpu.dot_dimension_numbers<[1], [0], [0], [1], [0, 0, 1, 1], [], []>} : vector<2x1xf32>, vector<1x4xf32>, vector<2x4xf32> -> vector<2x4xf32>
    %c0_12 = arith.constant 0 : index
    %c0_13 = arith.constant 0 : index
    %17 = vector.load %arg5[%c0_12, %c0_13] : memref<1x4xf32, #tpu.memory_space<vmem>>, vector<1x4xf32>
    %18 = vector.broadcast %17 : vector<1x4xf32> to vector<2x4xf32>
    %19 = arith.addf %16, %18 : vector<2x4xf32>
    %20 = arith.negf %19 : vector<2x4xf32>
    %21 = math.exp %20 : vector<2x4xf32>
    %cst_14 = arith.constant 1.000000e+00 : f32
    %22 = vector.broadcast %cst_14 : f32 to vector<2x4xf32>
    %23 = arith.addf %22, %21 : vector<2x4xf32>
    %24 = arith.divf %22, %23 : vector<2x4xf32>
    %25 = vector.shape_cast %24 : vector<2x4xf32> to vector<2x4x1xf32>
    %26 = vector.broadcast %25 : vector<2x4x1xf32> to vector<2x4x256xf32>
    %27 = arith.mulf %0, %26 : vector<2x4x256xf32>
    %c0_15 = arith.constant 0 : index
    %c0_16 = arith.constant 0 : index
    %c0_17 = arith.constant 0 : index
    %28 = vector.load %arg6[%c0_15, %c0_16, %c0_17] : memref<2x4x256xf32, #tpu.memory_space<vmem>>, vector<2x4x256xf32>
    tpu.vector_store %arg6[%c0_15, %c0_16, %c0_17], %27 {strides = array<i32>} : memref<2x4x256xf32, #tpu.memory_space<vmem>>, vector<2x4x256xf32>,
    return
  }
  func.func @transform_0(%arg0: i32) -> (i32, i32, i32) {
    %c0_i32 = arith.constant 0 : i32
    %c0_i32_0 = arith.constant 0 : i32
    %c0_i32_1 = arith.constant 0 : i32
    return %arg0, %c0_i32, %c0_i32_0 : i32, i32, i32
  }
  func.func @transform_1(%arg0: i32) -> (i32, i32) {
    %c0_i32 = arith.constant 0 : i32
    %c0_i32_0 = arith.constant 0 : i32
    %c0_i32_1 = arith.constant 0 : i32
    return %c0_i32, %c0_i32_0 : i32, i32
  }
  func.func @transform_2(%arg0: i32) -> (i32, i32) {
    %c0_i32 = arith.constant 0 : i32
    %c0_i32_0 = arith.constant 0 : i32
    %c0_i32_1 = arith.constant 0 : i32
    return %c0_i32, %c0_i32_0 : i32, i32
  }
  func.func @transform_3(%arg0: i32) -> (i32, i32) {
    %c0_i32 = arith.constant 0 : i32
    %c0_i32_0 = arith.constant 0 : i32
    %c0_i32_1 = arith.constant 0 : i32
    return %c0_i32, %c0_i32_0 : i32, i32
  }
  func.func @transform_4(%arg0: i32) -> (i32, i32) {
    %c0_i32 = arith.constant 0 : i32
    %c0_i32_0 = arith.constant 0 : i32
    %c0_i32_1 = arith.constant 0 : i32
    return %c0_i32, %c0_i32_0 : i32, i32
  }
  func.func @transform_5(%arg0: i32) -> (i32, i32, i32) {
    %c0_i32 = arith.constant 0 : i32
    %c0_i32_0 = arith.constant 0 : i32
    %c0_i32_1 = arith.constant 0 : i32
    return %arg0, %c0_i32, %c0_i32_0 : i32, i32, i32
  }
}

</mosaic_0001>

<bundles_post_ra>
// kernel: tpu_custom_call.1
= control target key start
LH: loop header
LB: loop body
LE: loop exit
PB: predicated region body
PF: predicated region fallthrough
CT: control target
= control target key end

     0   :  { %s369_s0 = inlined_call_operand.hbm [shape: f32[2,4,256], index: 0, kind: input, shape index: {}]   ;;  %s370_s1 = inlined_call_operand.vmem [shape: f32[4,1], index: 1, kind: input, shape index: {}]   ;;  %s371_s2 = inlined_call_operand.<no memory space> [shape: f32[1,1], index: 2, kind: input, shape index: {}]   ;;  %s372_s3 = inlined_call_operand.vmem [shape: f32[1,4], index: 3, kind: input, shape index: {}]   ;;  %s373_s4 = inlined_call_operand.vmem [shape: f32[1,4], index: 4, kind: input, shape index: {}]   ;;  %s374_s5 = inlined_call_operand.hbm [shape: f32[2,4,256], index: 5, kind: output, shape index: {}]  }
   0x1   :  { %v10_v0 = vstv %s371_s2 }
   0x2   :  { %11 = vst [vmem:[#allocation2] sm:$0x1] %v10_v0 }
   0x3   :  { %12 = vsyncpa [#allocation4], 0 }
   0x4   :  { %13 = vsyncpa [#allocation5], 0  ;;  %s18_s22 = sshll.u32 %s369_s0, 4  ;;  %s302_s23 = smov [#allocation3]   ;;  %s19_s22 = int_to_ptr.hbm [resolvable:$true] %s18_s22 }
   0x5   :  { %s20_s24 = sshll.u32 %s302_s23, 4  ;;  %s303_s25 = smov 128   ;;  %s21_s24 = int_to_ptr.vmem [resolvable:$true] %s20_s24 }
   0x6   :  { %s304_s26 = smov 8  }
   0x7   :  { %26 = dma.hbm_to_vmem [thread:$0]  %s19_s22, 256, %s21_s24, [#allocation4], %s303_s25, %s303_s25, %s304_s26  }
   0x8   :  { %298 = dma.done.wait [#allocation4], 256  }
   0x9   :  { %299 = vsyncadd [#allocation4], 4294967040  ;;  %v346_v1 = vld [vmem:[#allocation3] sm:$0xff]  ;;  %v348_v2 = vld [vmem:[#allocation3 + $0x8] sm:$0xff]  ;;  %vm54_vm0 = vcmask 1043456   ;;  %v74_v15 = vlaneseq  ;;  %vm78_vm1 = vcmask 1041409  }
   0xa   :  { %43 = vst [vmem:[#allocation1] ss:$2 sm:$0xff] %v346_v1  ;;  %v67_v13 = vld [vmem:[%s370_s1] sm:$0xf]  ;;  %vm80_vm2 = vcmask 31744   ;;  %vm135_vm3 = vcmask 1040384  }
   0xb   :  { %47 = vst [vmem:[#allocation1 + $0x10] ss:$2 sm:$0xff] %v348_v2  ;;  %227 = vmatpush.msk.msra.mxu0 %vm54_vm0, %v67_v13  ;;  %v75_v16 = vand.u32 127, %v74_v15  ;;  %v240_v23 = vld [vmem:[#allocation2] ss:$0 sm:$0xff]  ;;  %vm131_vm8 = vcmask 7168  }
   0xc   :  { %v126_v24 = vld [vmem:[%s372_s3] sm:$0x1]  ;;  %v180_v41 = vshrl.u32 %v74_v15, 7  ;;  %v305_v60 = vmov 839922192   ;;  %s214_s7 = sshll.u32 %s374_s5, 4  ;;  %s215_s7 = int_to_ptr.hbm [resolvable:$true] %s214_s7 }
   0xd   :  { %230 = vmatpush.msk.msra.mxu1 %vm135_vm3, %v126_v24  ;;  %v241_v42 = vld [vmem:[%s373_s4] ss:$0 sm:$0xff]  ;;  %v195_v61 = vunpack.c.l.s4 %v305_v60  ;;  %s306_s4 = smov [#allocation6]  }
   0xe   :  { %238 = vset.pattern.permute.xlu1 %v180_v41  ;;  %239 = vset.pattern.permute.xlu0 %v180_v41  ;;  %s212_s29 = sshll.u32 %s306_s4, 4  ;;  %s213_s29 = int_to_ptr.vmem [resolvable:$true] %s212_s29 }
   0xf   :  { %v196_v62 = vunpack.c.0.s8 %v195_v61 }
  0x11   :  { %v44_v3 = vld.sshfl [vmem:[#allocation1] sm:$0xff pattern:$0x75316420]  ;;  %v45_v4 = vld.sshfl [vmem:[#allocation1 + $0x8] sm:$0xff pattern:$0x75316420] }
  0x12   :  { %v55_v5 = vsel %vm54_vm0, %v44_v3, 0.0  ;;  %v56_v6 = vsel %vm54_vm0, %v45_v4, 0.0  ;;  %v48_v8 = vld.sshfl [vmem:[#allocation1 + $0x10] sm:$0xff pattern:$0x75316420] }
  0x13   :  { %v57_v7 = vadd.f32 %v56_v6, %v55_v5  ;;  %v49_v9 = vld.sshfl [vmem:[#allocation1 + $0x18] sm:$0xff pattern:$0x75316420]  ;;  %v60_v10 = vsel %vm54_vm0, %v48_v8, 0.0 }
  0x14   :  { %v61_v11 = vsel %vm54_vm0, %v49_v9, 0.0 }
  0x15   :  { %58 = vadd.xlane.f32.xlu0 %v57_v7  ;;  %v62_v12 = vadd.f32 %v61_v11, %v60_v10 }
  0x1d   :  { %63 = vadd.xlane.f32.xlu0 %v62_v12 }
  0x88   :  { %v59_v14 = vpop.xlane.xlu0 %58 }
  0x89   :  { %v65_v17 = vmul.f32 0.00390625, %v59_v14 }
  0x8b   :  { %v76_v20 = vperm.slane %v65_v17, %v75_v16 }
  0x90   :  { %v64_v18 = vpop.xlane.xlu0 %63 }
  0x91   :  { %v66_v19 = vmul.f32 0.00390625, %v64_v18 }
  0x93   :  { %v77_v21 = vperm.slane %v66_v19, %v75_v16 }
  0x95   :  { %v79_v22 = vsel %vm78_vm1, %v77_v21, %v76_v20 }
  0x96   :  { %228 = vmatmul.msk.f32.vlgmr.msra.gmra.mxu0 %vm80_vm2, %v79_v22 }
 0x113   :  { %v103_v25 = vpop.f32.mrf.mxu0 }
 0x114   :  { %v104_v26 = vadd.f32 %v240_v23, %v103_v25 }
 0x116   :  { %v229_v27 = vmul.f32 -1.442695, %v104_v26 }
 0x118   :  { %242 = vpow2.f32 %v229_v27 }
 0x11e   :  { %v243_v28 = vpop.eup %242 }
 0x11f   :  { %v109_v29 = vadd.f32 1.0, %v243_v28 }
 0x121   :  { %244 = vrcp.f32 %v109_v29  ;;  %v121_v33 = vand.u32 2147483648, %v109_v29  ;;  %v119_v35 = vand.u32 2147483647, %v109_v29  ;;  %vm115_vm5 = vweird.f32 %v109_v29 }
 0x123   :  { %v122_v37 = vor.u32 1.1754944e-38, %v121_v33  ;;  %vm120_vm7 = vcmp.eq.f32.partialorder %v119_v35, 8.507059e+37 }
 0x127   :  { %v245_v30 = vpop.eup %244 }
 0x128   :  { %v111_v31 = vmul.f32 %v245_v30, %v109_v29  ;;  %vm116_vm4 = vweird.f32 %v245_v30 }
 0x129   :  { %vm117_vm6 = vmor %vm115_vm5, %vm116_vm4 }
 0x12a   :  { %v112_v32 = vsub.f32 1.0, %v111_v31 }
 0x12c   :  { %v113_v34 = vmul.f32 %v245_v30, %v112_v32 }
 0x12e   :  { %v114_v36 = vadd.f32 %v245_v30, %v113_v34 }
 0x130   :  { %v118_v38 = vsel %vm117_vm6, %v245_v30, %v114_v36 }
 0x131   :  { %v123_v39 = vsel %vm120_vm7, %v122_v37, %v118_v38 }
 0x132   :  { %v125_v40 = vmul.f32 %v123_v39, %v104_v26 }
 0x134   :  { %231 = vmatmul.msk.f32.vlgmr.msra.gmra.mxu1 %vm131_vm8, %v125_v40 }
 0x1b1   :  { %v156_v43 = vpop.f32.mrf.mxu1 }
 0x1b2   :  { %v157_v44 = vadd.f32 %v241_v42, %v156_v43 }
 0x1b4   :  { %v232_v45 = vmul.f32 -1.442695, %v157_v44 }
 0x1b6   :  { %246 = vpow2.f32 %v232_v45 }
 0x1bc   :  { %v247_v46 = vpop.eup %246 }
 0x1bd   :  { %v162_v47 = vadd.f32 1.0, %v247_v46 }
 0x1bf   :  { %248 = vrcp.f32 %v162_v47  ;;  %v174_v51 = vand.u32 2147483648, %v162_v47  ;;  %v172_v53 = vand.u32 2147483647, %v162_v47  ;;  %vm168_vm10 = vweird.f32 %v162_v47 }
 0x1c1   :  { %v175_v55 = vor.u32 1.1754944e-38, %v174_v51  ;;  %vm173_vm12 = vcmp.eq.f32.partialorder %v172_v53, 8.507059e+37 }
 0x1c5   :  { %v249_v48 = vpop.eup %248 }
 0x1c6   :  { %v164_v49 = vmul.f32 %v249_v48, %v162_v47  ;;  %vm169_vm9 = vweird.f32 %v249_v48 }
 0x1c7   :  { %vm170_vm11 = vmor %vm168_vm10, %vm169_vm9 }
 0x1c8   :  { %v165_v50 = vsub.f32 1.0, %v164_v49 }
 0x1ca   :  { %v166_v52 = vmul.f32 %v249_v48, %v165_v50 }
 0x1cc   :  { %v167_v54 = vadd.f32 %v249_v48, %v166_v52 }
 0x1ce   :  { %v171_v56 = vsel %vm170_vm11, %v249_v48, %v167_v54 }
 0x1cf   :  { %v176_v57 = vsel %vm173_vm12, %v175_v55, %v171_v56 }
 0x1d0   :  { %v178_v58 = vperm.slane %v176_v57, 0  ;;  %v185_v59 = vperm.slane %v176_v57, 1 }
 0x1d2   :  { %183 = vperm.xlu1 %238, %v178_v58  }
 0x1da   :  { %190 = vperm.xlu1 %238, %v185_v59  }
 0x244   :  { %v184_v63 = vpop.permute.xlu1 %183 }
 0x245   :  { %v197_v0 = vperm.slane %v184_v63, %v196_v62 }
 0x247   :  { %v204_v3 = vmul.f32 %v197_v0, %v346_v1 }
 0x249   :  { %206 = vst [vmem:[#allocation6] sm:$0xff] %v204_v3 }
 0x24c   :  { %v191_v4 = vpop.permute.xlu1 %190 }
 0x24d   :  { %v201_v5 = vperm.slane %v191_v4, %v196_v62 }
 0x24f   :  { %v205_v6 = vmul.f32 %v201_v5, %v348_v2 }
 0x251   :  { %207 = vst [vmem:[#allocation6 + $0x8] sm:$0xff] %v205_v6 }
 0x252   :  { %220 = dma.vmem_to_hbm [thread:$0]  %s213_s29, 256, %s215_s7, [#allocation5], %s303_s25, %s303_s25, %s304_s26  }
 0x253   :  { %300 = dma.done.wait [#allocation5], 256  }
 0x254   :  { %301 = vsyncadd [#allocation5], 4294967040 }
 0x255   :  { %225 = vsyncpa [#allocation4], 1 }
 0x256   :  { %226 = vsyncpa [#allocation5], 1 }

</bundles_post_ra>
